<compile_context>
chip_gen: v7x
topology: tpu7x:2x2x1
jax: 0.10.0
libtpu: 0.0.40
codegen_flags: <defaults>
</compile_context>

<pallas_src>
import functools
import math

import jax
import jax.numpy as jnp
from jax import lax
from jax.experimental import pallas as pl
from jax.experimental.pallas import tpu as pltpu

_MASK_VALUE = -1e30   # large finite negative: avoids -inf arithmetic hazards


# --------------------------------------------------------------------------
# Stage 1: fused QKV projection (runs once per token).
# --------------------------------------------------------------------------
def _qkv_projection_kernel(x_ref, w_ref, b_ref, q_ref, k_ref, v_ref, *,
                           inv_scale):
    d = q_ref.shape[-1]
    x = x_ref[0]                                              # (ts, D) bf16
    qkv = jnp.dot(x, w_ref[...], preferred_element_type=jnp.float32)
    qkv = qkv + b_ref[...]                                    # (ts, 3D) f32
    # 1/sqrt(d_head) is folded into Q once (scores are then just q.k).
    q_ref[0] = (qkv[:, 0 * d:1 * d] * inv_scale).astype(q_ref.dtype)
    k_ref[0] = qkv[:, 1 * d:2 * d].astype(k_ref.dtype)
    v_ref[0] = qkv[:, 2 * d:3 * d].astype(v_ref.dtype)


# --------------------------------------------------------------------------
# Stage 2: flash attention (online softmax over KV tiles) + fused out_proj.
# --------------------------------------------------------------------------
def _flash_attention_out_proj_kernel(
        q_ref, k_ref, v_ref, wo_ref, bo_ref,       # inputs
        o_ref,                                     # output
        m_scr, l_scr, acc_scr,                     # scratch (persist over ki)
        *, n_heads, d_head, tq, tk, causal):
    qi = pl.program_id(1)
    ki = pl.program_id(2)
    n_kv = pl.num_programs(2)
    H, dh = n_heads, d_head

    @pl.when(ki == 0)
    def _init():
        m_scr[...] = jnp.full_like(m_scr, _MASK_VALUE)
        l_scr[...] = jnp.zeros_like(l_scr)
        acc_scr[...] = jnp.zeros_like(acc_scr)

    def _attend():
        if causal:
            # Additive mask tile, built once per step and shared by all heads.
            row = qi * tq + lax.broadcasted_iota(jnp.int32, (tq, tk), 0)
            col = ki * tk + lax.broadcasted_iota(jnp.int32, (tq, tk), 1)
            neg = jnp.where(col > row, _MASK_VALUE, 0.0).astype(jnp.float32)

        m_prev = m_scr[...]                                   # (tq, H) f32
        l_prev = l_scr[...]                                   # (tq, H) f32
        m_cols, l_cols = [], []
        for h in range(H):                                    # static unroll
            lo, hi = h * dh, (h + 1) * dh
            qh = q_ref[0, :, lo:hi]                           # (tq, dh) bf16
            kh = k_ref[0, :, lo:hi]                           # (tk, dh) bf16
            vh = v_ref[0, :, lo:hi]                           # (tk, dh) bf16
            # scores: contract over dh -> (tq, tk), f32 accumulate on MXU.
            s = lax.dot_general(qh, kh, (((1,), (1,)), ((), ())),
                                preferred_element_type=jnp.float32)
            if causal:
                s = s + neg
            m_h_prev = m_prev[:, h:h + 1]                     # (tq, 1)
            m_h = jnp.maximum(m_h_prev, jnp.max(s, axis=-1, keepdims=True))
            alpha = jnp.exp(m_h_prev - m_h)                   # (tq, 1)
            p = jnp.exp(s - m_h)                              # (tq, tk) f32
            l_h = alpha * l_prev[:, h:h + 1] + jnp.sum(p, axis=-1,
                                                       keepdims=True)
            pv = jnp.dot(p.astype(vh.dtype), vh,
                         preferred_element_type=jnp.float32)  # (tq, dh) f32
            # Lane-dense accumulator: head h occupies columns [h*dh, (h+1)*dh)
            acc_scr[:, lo:hi] = alpha * acc_scr[:, lo:hi] + pv
            m_cols.append(m_h)
            l_cols.append(l_h)
        # One store per step for the flash stats (instead of H tiny stores).
        m_scr[...] = jnp.concatenate(m_cols, axis=1)
        l_scr[...] = jnp.concatenate(l_cols, axis=1)

    if causal:
        # KV tiles entirely above the diagonal: skip all compute.
        pl.when(ki * tk <= qi * tq + (tq - 1))(_attend)
    else:
        _attend()

    @pl.when(ki == n_kv - 1)
    def _finalize():
        inv_l = pl.reciprocal(l_scr[...], approx=True)        # (tq, H)
        for h in range(H):
            lo, hi = h * dh, (h + 1) * dh
            acc_scr[:, lo:hi] = acc_scr[:, lo:hi] * inv_l[:, h:h + 1]
        # Head-concat is implicit (accumulator is already (tq, D) lane-dense):
        # one full-K MXU matmul fuses the out-projection.
        attn = acc_scr[...].astype(wo_ref.dtype)              # (tq, D) bf16
        out = jnp.dot(attn, wo_ref[...],
                      preferred_element_type=jnp.float32) + bo_ref[...]
        o_ref[0] = out.astype(o_ref.dtype)


# --------------------------------------------------------------------------
# Helpers.
# --------------------------------------------------------------------------
def _choose_tile(dim: int, preferred: int) -> int:
    """Largest multiple of 8 that divides `dim` and is <= preferred (else dim)."""
    if dim <= preferred:
        return dim
    t = (preferred // 8) * 8
    while t >= 8:
        if dim % t == 0:
            return t
        t -= 8
    return dim


def _chip_defaults():
    """(q_tile, kv_tile, vmem_limit_bytes) tuned per TPU generation."""
    vmem_bytes = 64 * 1024 * 1024
    try:
        info = pltpu.get_tpu_info()
        vmem_bytes = int(getattr(info, "vmem_capacity_bytes", vmem_bytes))
    except Exception:
        pass
    if vmem_bytes >= 100 * 1024 * 1024:          # v5e / v6e: 128 MiB VMEM
        return 512, 512, 100 * 1024 * 1024
    return 256, 256, 48 * 1024 * 1024            # v7x: 64 MiB VMEM


def _const_spec_factory(single_buffer):
    """BlockSpec factory for constant-index (weight / bias) blocks."""
    def make(shape, index_map):
        if single_buffer:
            # Block index never changes -> single buffer halves weight VMEM.
            return pl.BlockSpec(shape, index_map, pipeline_mode=pl.Buffered(1))
        return pl.BlockSpec(shape, index_map)
    return make


_SINGLE_BUFFER_WEIGHTS_OK = None   # lazily probed: None=unknown


def _call_with_fallback(build_fn, args):
    """Run with single-buffered constant weights; fall back to default
    double buffering if this Pallas build rejects pipeline_mode=Buffered(1)."""
    global _SINGLE_BUFFER_WEIGHTS_OK
    if _SINGLE_BUFFER_WEIGHTS_OK is False:
        return build_fn(False)(*args)
    try:
        out = build_fn(True)(*args)
        if _SINGLE_BUFFER_WEIGHTS_OK is None:
            out = jax.block_until_ready(out)   # surface runtime errors once
        _SINGLE_BUFFER_WEIGHTS_OK = True
        return out
    except Exception:
        _SINGLE_BUFFER_WEIGHTS_OK = False
        return build_fn(False)(*args)


# --------------------------------------------------------------------------
# Public wrapper.
# --------------------------------------------------------------------------
def self_attention(x, w_in, b_in, w_out, b_out, *, n_heads, causal_mask=False,
                   q_tile=None, kv_tile=None, compute_dtype=jnp.bfloat16):
    """x: (B, S, D).  Weights stored for right-multiplication:
       w_in: (D, 3D), b_in: (1, 3D), w_out: (D, D), b_out: (1, D)."""
    B, S, D = x.shape
    assert D % n_heads == 0
    dh = D // n_heads
    pref_q, pref_kv, vmem_limit = _chip_defaults()
    tq = _choose_tile(S, q_tile if q_tile is not None else pref_q)
    tk = _choose_tile(S, kv_tile if kv_tile is not None else pref_kv)
    n_q, n_kv = S // tq, S // tk
    ts = tq                                       # projection sequence tile
    cd = compute_dtype
    inv_scale = 1.0 / math.sqrt(dh)

    x_c = x.astype(cd)
    w_in_c = w_in.astype(cd)
    b_in_f = b_in.astype(jnp.float32)
    w_out_c = w_out.astype(cd)
    b_out_f = b_out.astype(jnp.float32)

    # ---- stage 1: QKV projection (once per token, not once per q-tile) ----
    def build_proj(single_buffer_weights):
        wspec = _const_spec_factory(single_buffer_weights)
        return pl.pallas_call(
            functools.partial(_qkv_projection_kernel, inv_scale=inv_scale),
            out_shape=tuple(jax.ShapeDtypeStruct((B, S, D), cd)
                            for _ in range(3)),
            grid_spec=pltpu.PrefetchScalarGridSpec(
                num_scalar_prefetch=0,
                grid=(B, S // ts),
                in_specs=[
                    pl.BlockSpec((1, ts, D), lambda b, si: (b, si, 0)),   # x
                    wspec((D, 3 * D), lambda b, si: (0, 0)),              # W_in
                    wspec((1, 3 * D), lambda b, si: (0, 0)),              # b_in
                ],
                out_specs=tuple(
                    pl.BlockSpec((1, ts, D), lambda b, si: (b, si, 0))
                    for _ in range(3))),
            compiler_params=pltpu.CompilerParams(
                dimension_semantics=("parallel", "parallel"),
                vmem_limit_bytes=vmem_limit),
        )

    q_s, k_s, v_s = _call_with_fallback(build_proj, (x_c, w_in_c, b_in_f))

    # ---- stage 2: flash attention + fused out-projection -------------------
    if causal_mask:
        def kv_map(b, qi, ki):
            # Clamp fully-skipped KV tiles to an already-resident block so the
            # pipeline issues no DMA for them.
            last = (qi * tq + (tq - 1)) // tk
            return (b, jnp.minimum(ki, last), 0)
    else:
        def kv_map(b, qi, ki):
            return (b, ki, 0)

    kernel = functools.partial(
        _flash_attention_out_proj_kernel, n_heads=n_heads, d_head=dh,
        tq=tq, tk=tk, causal=bool(causal_mask))

    def build_attn(single_buffer_weights):
        wspec = _const_spec_factory(single_buffer_weights)
        return pl.pallas_call(
            kernel,
            out_shape=jax.ShapeDtypeStruct((B, S, D), x.dtype),
            grid_spec=pltpu.PrefetchScalarGridSpec(
                num_scalar_prefetch=0,
                grid=(B, n_q, n_kv),
                in_specs=[
                    pl.BlockSpec((1, tq, D), lambda b, qi, ki: (b, qi, 0)),  # Q
                    pl.BlockSpec((1, tk, D), kv_map),                        # K
                    pl.BlockSpec((1, tk, D), kv_map),                        # V
                    wspec((D, D), lambda b, qi, ki: (0, 0)),                 # W_out
                    wspec((1, D), lambda b, qi, ki: (0, 0)),                 # b_out
                ],
                out_specs=pl.BlockSpec((1, tq, D),
                                       lambda b, qi, ki: (b, qi, 0)),
                scratch_shapes=[
                    pltpu.VMEM((tq, n_heads), jnp.float32),   # running max
                    pltpu.VMEM((tq, n_heads), jnp.float32),   # running denom
                    pltpu.VMEM((tq, D), jnp.float32),         # lane-dense acc
                ]),
            compiler_params=pltpu.CompilerParams(
                dimension_semantics=("parallel", "parallel", "arbitrary"),
                vmem_limit_bytes=vmem_limit),
        )

    return _call_with_fallback(build_attn, (q_s, k_s, v_s, w_out_c, b_out_f))


# --------------------------------------------------------------------------
# Reference + self-test.
# --------------------------------------------------------------------------
def _init_linear(key, fan_in, fan_out):
    # Deterministic init mimicking nn.Linear's default U(-1/sqrt(fan_in), +).
    kw, kb = jax.random.split(key)
    bound = 1.0 / math.sqrt(fan_in)
    w = jax.random.uniform(kw, (fan_in, fan_out), jnp.float32, -bound, bound)
    b = jax.random.uniform(kb, (1, fan_out), jnp.float32, -bound, bound)
    return w, b


def _reference(x, w_in, b_in, w_out, b_out, n_heads, causal):
    B, S, D = x.shape
    dh = D // n_heads
    qkv = x @ w_in + b_in
    q, k, v = jnp.split(qkv, 3, axis=-1)
    q = q.reshape(B, S, n_heads, dh).transpose(0, 2, 1, 3)
    k = k.reshape(B, S, n_heads, dh).transpose(0, 2, 1, 3)
    v = v.reshape(B, S, n_heads, dh).transpose(0, 2, 1, 3)
    w = jnp.einsum("bhqd,bhkd->bhqk", q, k)
    if causal:
        mask = jnp.triu(jnp.ones((S, S), dtype=bool), 1)
        w = jnp.where(mask, -jnp.inf, w)
    w = w / math.sqrt(dh)
    p = jax.nn.softmax(w, axis=-1)
    o = jnp.einsum("bhqk,bhkd->bhqd", p, v)
    o = o.transpose(0, 2, 1, 3).reshape(B, S, D)
    return o @ w_out + b_out


if __name__ == "__main__":
    key = jax.random.PRNGKey(0)

    configs = [
        # (B, S, D, n_heads, q_tile, kv_tile)
        (2, 8, 32, 4, None, None),   # single-tile path
        (2, 32, 32, 4, 8, 8),        # multi-tile: online softmax over 4 KV
                                     # tiles, causal tile-skip, finalize path
    ]
    for (B, S, D, H, qt, kt) in configs:
        kx, kin, kout, key = jax.random.split(key, 4)
        x = jax.random.normal(kx, (B, S, D), jnp.float32)
        w_in, b_in = _init_linear(kin, D, 3 * D)
        w_out, b_out = _init_linear(kout, D, D)
        for causal in (False, True):
            out = self_attention(x, w_in, b_in, w_out, b_out, n_heads=H,
                                 causal_mask=causal, q_tile=qt, kv_tile=kt)
            out = jax.block_until_ready(out)
            ref = _reference(x, w_in, b_in, w_out, b_out, H, causal)
            # bf16 MXU inputs + approx reciprocal -> loose tolerance vs f32 ref.
            err = jnp.max(jnp.abs(out - ref))
            assert jnp.allclose(out, ref, atol=5e-2, rtol=5e-2), (
                f"mismatch B={B} S={S} D={D} H={H} causal={causal}: "
                f"max abs err = {err}")
    print("KERNEL_OK")
</pallas_src>

<mosaic_0001>
module attributes {stable_mosaic.version = 11 : i64} {
  func.func @_qkv_projection_kernel(%arg0: i32, %arg1: i32, %arg2: memref<1x8x32xbf16, #tpu.memory_space<vmem>>, %arg3: memref<32x96xbf16, #tpu.memory_space<vmem>>, %arg4: memref<1x96xf32, #tpu.memory_space<vmem>>, %arg5: memref<1x8x32xbf16, #tpu.memory_space<vmem>>, %arg6: memref<1x8x32xbf16, #tpu.memory_space<vmem>>, %arg7: memref<1x8x32xbf16, #tpu.memory_space<vmem>>) attributes {dimension_semantics = [#tpu.dimension_semantics<parallel>, #tpu.dimension_semantics<parallel>], iteration_bounds = array<i64: 2, 1>, scalar_prefetch = 0 : i64, scratch_operands = 0 : i64, tpu.core_type = #tpu.core_type<tc>, window_params = [{transform_indices = @transform_0, window_bounds = array<i64: 1, 8, 32>}, {pipeline_mode = #tpu.pipeline_mode<synchronous>, transform_indices = @transform_1, window_bounds = array<i64: 32, 96>}, {pipeline_mode = #tpu.pipeline_mode<synchronous>, transform_indices = @transform_2, window_bounds = array<i64: 1, 96>}, {transform_indices = @transform_3, window_bounds = array<i64: 1, 8, 32>}, {transform_indices = @transform_4, window_bounds = array<i64: 1, 8, 32>}, {transform_indices = @transform_5, window_bounds = array<i64: 1, 8, 32>}]} {
    %c0 = arith.constant 0 : index
    %c0_0 = arith.constant 0 : index
    %c0_1 = arith.constant 0 : index
    %0 = vector.load %arg2[%c0, %c0_0, %c0_1] : memref<1x8x32xbf16, #tpu.memory_space<vmem>>, vector<1x8x32xbf16>
    %1 = vector.shape_cast %0 : vector<1x8x32xbf16> to vector<8x32xbf16>
    %c0_2 = arith.constant 0 : index
    %c0_3 = arith.constant 0 : index
    %2 = vector.load %arg3[%c0_2, %c0_3] : memref<32x96xbf16, #tpu.memory_space<vmem>>, vector<32x96xbf16>
    %cst = arith.constant dense<0.000000e+00> : vector<8x96xf32>
    %3 = tpu.matmul %1, %2, %cst {dimension_numbers = #tpu.dot_dimension_numbers<[1], [0], [0], [1], [0, 0, 1, 1], [], []>} : vector<8x32xbf16>, vector<32x96xbf16>, vector<8x96xf32> -> vector<8x96xf32>
    %c0_4 = arith.constant 0 : index
    %c0_5 = arith.constant 0 : index
    %4 = vector.load %arg4[%c0_4, %c0_5] : memref<1x96xf32, #tpu.memory_space<vmem>>, vector<1x96xf32>
    %5 = vector.broadcast %4 : vector<1x96xf32> to vector<8x96xf32>
    %6 = arith.addf %3, %5 : vector<8x96xf32>
    %7 = vector.extract_strided_slice %6 {offsets = [0, 0], sizes = [8, 32], strides = [1, 1]} : vector<8x96xf32> to vector<8x32xf32>
    %cst_6 = arith.constant 0.353553385 : f32
    %8 = vector.broadcast %cst_6 : f32 to vector<8x32xf32>
    %9 = arith.mulf %7, %8 : vector<8x32xf32>
    %10 = arith.truncf %9 : vector<8x32xf32> to vector<8x32xbf16>
    %c0_7 = arith.constant 0 : index
    %c0_8 = arith.constant 0 : index
    %c0_9 = arith.constant 0 : index
    %11 = vector.load %arg5[%c0_7, %c0_8, %c0_9] : memref<1x8x32xbf16, #tpu.memory_space<vmem>>, vector<1x8x32xbf16>
    %12 = vector.shape_cast %11 : vector<1x8x32xbf16> to vector<8x32xbf16>
    %13 = vector.shape_cast %10 : vector<8x32xbf16> to vector<1x8x32xbf16>
    tpu.vector_store %arg5[%c0_7, %c0_8, %c0_9], %13 {strides = array<i32>} : memref<1x8x32xbf16, #tpu.memory_space<vmem>>, vector<1x8x32xbf16>,
    %14 = vector.extract_strided_slice %6 {offsets = [0, 32], sizes = [8, 32], strides = [1, 1]} : vector<8x96xf32> to vector<8x32xf32>
    %15 = arith.truncf %14 : vector<8x32xf32> to vector<8x32xbf16>
    %c0_10 = arith.constant 0 : index
    %c0_11 = arith.constant 0 : index
    %c0_12 = arith.constant 0 : index
    %16 = vector.load %arg6[%c0_10, %c0_11, %c0_12] : memref<1x8x32xbf16, #tpu.memory_space<vmem>>, vector<1x8x32xbf16>
    %17 = vector.shape_cast %16 : vector<1x8x32xbf16> to vector<8x32xbf16>
    %18 = vector.shape_cast %15 : vector<8x32xbf16> to vector<1x8x32xbf16>
    tpu.vector_store %arg6[%c0_10, %c0_11, %c0_12], %18 {strides = array<i32>} : memref<1x8x32xbf16, #tpu.memory_space<vmem>>, vector<1x8x32xbf16>,
    %19 = vector.extract_strided_slice %6 {offsets = [0, 64], sizes = [8, 32], strides = [1, 1]} : vector<8x96xf32> to vector<8x32xf32>
    %20 = arith.truncf %19 : vector<8x32xf32> to vector<8x32xbf16>
    %c0_13 = arith.constant 0 : index
    %c0_14 = arith.constant 0 : index
    %c0_15 = arith.constant 0 : index
    %21 = vector.load %arg7[%c0_13, %c0_14, %c0_15] : memref<1x8x32xbf16, #tpu.memory_space<vmem>>, vector<1x8x32xbf16>
    %22 = vector.shape_cast %21 : vector<1x8x32xbf16> to vector<8x32xbf16>
    %23 = vector.shape_cast %20 : vector<8x32xbf16> to vector<1x8x32xbf16>
    tpu.vector_store %arg7[%c0_13, %c0_14, %c0_15], %23 {strides = array<i32>} : memref<1x8x32xbf16, #tpu.memory_space<vmem>>, vector<1x8x32xbf16>,
    return
  }
  func.func @transform_0(%arg0: i32, %arg1: i32) -> (i32, i32, i32) {
    %c0_i32 = arith.constant 0 : i32
    %c0_i32_0 = arith.constant 0 : i32
    return %arg0, %arg1, %c0_i32 : i32, i32, i32
  }
  func.func @transform_1(%arg0: i32, %arg1: i32) -> (i32, i32) {
    %c0_i32 = arith.constant 0 : i32
    %c0_i32_0 = arith.constant 0 : i32
    %c0_i32_1 = arith.constant 0 : i32
    return %c0_i32, %c0_i32_0 : i32, i32
  }
  func.func @transform_2(%arg0: i32, %arg1: i32) -> (i32, i32) {
    %c0_i32 = arith.constant 0 : i32
    %c0_i32_0 = arith.constant 0 : i32
    %c0_i32_1 = arith.constant 0 : i32
    return %c0_i32, %c0_i32_0 : i32, i32
  }
  func.func @transform_3(%arg0: i32, %arg1: i32) -> (i32, i32, i32) {
    %c0_i32 = arith.constant 0 : i32
    %c0_i32_0 = arith.constant 0 : i32
    return %arg0, %arg1, %c0_i32 : i32, i32, i32
  }
  func.func @transform_4(%arg0: i32, %arg1: i32) -> (i32, i32, i32) {
    %c0_i32 = arith.constant 0 : i32
    %c0_i32_0 = arith.constant 0 : i32
    return %arg0, %arg1, %c0_i32 : i32, i32, i32
  }
  func.func @transform_5(%arg0: i32, %arg1: i32) -> (i32, i32, i32) {
    %c0_i32 = arith.constant 0 : i32
    %c0_i32_0 = arith.constant 0 : i32
    return %arg0, %arg1, %c0_i32 : i32, i32, i32
  }
}

module attributes {stable_mosaic.version = 11 : i64} {
  func.func @_qkv_projection_kernel(%arg0: i32, %arg1: i32, %arg2: memref<1x8x32xbf16, #tpu.memory_space<vmem>>, %arg3: memref<32x96xbf16, #tpu.memory_space<vmem>>, %arg4: memref<1x96xf32, #tpu.memory_space<vmem>>, %arg5: memref<1x8x32xbf16, #tpu.memory_space<vmem>>, %arg6: memref<1x8x32xbf16, #tpu.memory_space<vmem>>, %arg7: memref<1x8x32xbf16, #tpu.memory_space<vmem>>) attributes {dimension_semantics = [#tpu.dimension_semantics<parallel>, #tpu.dimension_semantics<parallel>], iteration_bounds = array<i64: 2, 1>, scalar_prefetch = 0 : i64, scratch_operands = 0 : i64, tpu.core_type = #tpu.core_type<tc>, window_params = [{transform_indices = @transform_0, window_bounds = array<i64: 1, 8, 32>}, {pipeline_mode = #tpu.pipeline_mode<synchronous>, transform_indices = @transform_1, window_bounds = array<i64: 32, 96>}, {pipeline_mode = #tpu.pipeline_mode<synchronous>, transform_indices = @transform_2, window_bounds = array<i64: 1, 96>}, {transform_indices = @transform_3, window_bounds = array<i64: 1, 8, 32>}, {transform_indices = @transform_4, window_bounds = array<i64: 1, 8, 32>}, {transform_indices = @transform_5, window_bounds = array<i64: 1, 8, 32>}]} {
    %c0 = arith.constant 0 : index
    %c0_0 = arith.constant 0 : index
    %c0_1 = arith.constant 0 : index
    %0 = vector.load %arg2[%c0, %c0_0, %c0_1] : memref<1x8x32xbf16, #tpu.memory_space<vmem>>, vector<1x8x32xbf16>
    %1 = vector.shape_cast %0 : vector<1x8x32xbf16> to vector<8x32xbf16>
    %c0_2 = arith.constant 0 : index
    %c0_3 = arith.constant 0 : index
    %2 = vector.load %arg3[%c0_2, %c0_3] : memref<32x96xbf16, #tpu.memory_space<vmem>>, vector<32x96xbf16>
    %cst = arith.constant dense<0.000000e+00> : vector<8x96xf32>
    %3 = tpu.matmul %1, %2, %cst {dimension_numbers = #tpu.dot_dimension_numbers<[1], [0], [0], [1], [0, 0, 1, 1], [], []>} : vector<8x32xbf16>, vector<32x96xbf16>, vector<8x96xf32> -> vector<8x96xf32>
    %c0_4 = arith.constant 0 : index
    %c0_5 = arith.constant 0 : index
    %4 = vector.load %arg4[%c0_4, %c0_5] : memref<1x96xf32, #tpu.memory_space<vmem>>, vector<1x96xf32>
    %5 = vector.broadcast %4 : vector<1x96xf32> to vector<8x96xf32>
    %6 = arith.addf %3, %5 : vector<8x96xf32>
    %7 = vector.extract_strided_slice %6 {offsets = [0, 0], sizes = [8, 32], strides = [1, 1]} : vector<8x96xf32> to vector<8x32xf32>
    %cst_6 = arith.constant 0.353553385 : f32
    %8 = vector.broadcast %cst_6 : f32 to vector<8x32xf32>
    %9 = arith.mulf %7, %8 : vector<8x32xf32>
    %10 = arith.truncf %9 : vector<8x32xf32> to vector<8x32xbf16>
    %c0_7 = arith.constant 0 : index
    %c0_8 = arith.constant 0 : index
    %c0_9 = arith.constant 0 : index
    %11 = vector.load %arg5[%c0_7, %c0_8, %c0_9] : memref<1x8x32xbf16, #tpu.memory_space<vmem>>, vector<1x8x32xbf16>
    %12 = vector.shape_cast %11 : vector<1x8x32xbf16> to vector<8x32xbf16>
    %13 = vector.shape_cast %10 : vector<8x32xbf16> to vector<1x8x32xbf16>
    tpu.vector_store %arg5[%c0_7, %c0_8, %c0_9], %13 {strides = array<i32>} : memref<1x8x32xbf16, #tpu.memory_space<vmem>>, vector<1x8x32xbf16>,
    %14 = vector.extract_strided_slice %6 {offsets = [0, 32], sizes = [8, 32], strides = [1, 1]} : vector<8x96xf32> to vector<8x32xf32>
    %15 = arith.truncf %14 : vector<8x32xf32> to vector<8x32xbf16>
    %c0_10 = arith.constant 0 : index
    %c0_11 = arith.constant 0 : index
    %c0_12 = arith.constant 0 : index
    %16 = vector.load %arg6[%c0_10, %c0_11, %c0_12] : memref<1x8x32xbf16, #tpu.memory_space<vmem>>, vector<1x8x32xbf16>
    %17 = vector.shape_cast %16 : vector<1x8x32xbf16> to vector<8x32xbf16>
    %18 = vector.shape_cast %15 : vector<8x32xbf16> to vector<1x8x32xbf16>
    tpu.vector_store %arg6[%c0_10, %c0_11, %c0_12], %18 {strides = array<i32>} : memref<1x8x32xbf16, #tpu.memory_space<vmem>>, vector<1x8x32xbf16>,
    %19 = vector.extract_strided_slice %6 {offsets = [0, 64], sizes = [8, 32], strides = [1, 1]} : vector<8x96xf32> to vector<8x32xf32>
    %20 = arith.truncf %19 : vector<8x32xf32> to vector<8x32xbf16>
    %c0_13 = arith.constant 0 : index
    %c0_14 = arith.constant 0 : index
    %c0_15 = arith.constant 0 : index
    %21 = vector.load %arg7[%c0_13, %c0_14, %c0_15] : memref<1x8x32xbf16, #tpu.memory_space<vmem>>, vector<1x8x32xbf16>
    %22 = vector.shape_cast %21 : vector<1x8x32xbf16> to vector<8x32xbf16>
    %23 = vector.shape_cast %20 : vector<8x32xbf16> to vector<1x8x32xbf16>
    tpu.vector_store %arg7[%c0_13, %c0_14, %c0_15], %23 {strides = array<i32>} : memref<1x8x32xbf16, #tpu.memory_space<vmem>>, vector<1x8x32xbf16>,
    return
  }
  func.func @transform_0(%arg0: i32, %arg1: i32) -> (i32, i32, i32) {
    %c0_i32 = arith.constant 0 : i32
    %c0_i32_0 = arith.constant 0 : i32
    return %arg0, %arg1, %c0_i32 : i32, i32, i32
  }
  func.func @transform_1(%arg0: i32, %arg1: i32) -> (i32, i32) {
    %c0_i32 = arith.constant 0 : i32
    %c0_i32_0 = arith.constant 0 : i32
    %c0_i32_1 = arith.constant 0 : i32
    return %c0_i32, %c0_i32_0 : i32, i32
  }
  func.func @transform_2(%arg0: i32, %arg1: i32) -> (i32, i32) {
    %c0_i32 = arith.constant 0 : i32
    %c0_i32_0 = arith.constant 0 : i32
    %c0_i32_1 = arith.constant 0 : i32
    return %c0_i32, %c0_i32_0 : i32, i32
  }
  func.func @transform_3(%arg0: i32, %arg1: i32) -> (i32, i32, i32) {
    %c0_i32 = arith.constant 0 : i32
    %c0_i32_0 = arith.constant 0 : i32
    return %arg0, %arg1, %c0_i32 : i32, i32, i32
  }
  func.func @transform_4(%arg0: i32, %arg1: i32) -> (i32, i32, i32) {
    %c0_i32 = arith.constant 0 : i32
    %c0_i32_0 = arith.constant 0 : i32
    return %arg0, %arg1, %c0_i32 : i32, i32, i32
  }
  func.func @transform_5(%arg0: i32, %arg1: i32) -> (i32, i32, i32) {
    %c0_i32 = arith.constant 0 : i32
    %c0_i32_0 = arith.constant 0 : i32
    return %arg0, %arg1, %c0_i32 : i32, i32, i32
  }
}

</mosaic_0001>

<bundles_post_ra>
// kernel: tpu_custom_call.1
= control target key start
LH: loop header
LB: loop body
LE: loop exit
PB: predicated region body
PF: predicated region fallthrough
CT: control target
= control target key end

     0   :  { %11 = vsyncpa [#allocation3], 0  ;;  %s1260_s0 = inlined_call_operand.hbm [shape: bf16[2,8,32], index: 0, kind: input, shape index: {}]   ;;  %s1261_s1 = inlined_call_operand.hbm [shape: bf16[32,96], index: 1, kind: input, shape index: {}]   ;;  %s1262_s2 = inlined_call_operand.vmem [shape: f32[1,96], index: 2, kind: input, shape index: {}]   ;;  %s1263_s3 = inlined_call_operand.hbm [shape: bf16[2,8,32], index: 3, kind: output, shape index: {0}]   ;;  %s1264_s4 = inlined_call_operand.hbm [shape: bf16[2,8,32], index: 4, kind: output, shape index: {1}]   ;;  %s1265_s5 = inlined_call_operand.hbm [shape: bf16[2,8,32], index: 5, kind: output, shape index: {2}]  }
   0x1   :  { %13 = vsyncpa [#allocation3 + $0x1], 0 }
   0x2   :  { %14 = vsyncpa [#allocation6], 0 }
   0x3   :  { %15 = vsyncpa [#allocation4], 0 }
   0x4   :  { %17 = vsyncpa [#allocation4 + $0x1], 0 }
   0x5   :  { %18 = vsyncpa [#allocation9], 0 }
   0x6   :  { %20 = vsyncpa [#allocation9 + $0x1], 0  ;;  %s961_s18 = smov 0   ;;  %s963_s19 = smov 0  }
   0x7   :  { %s965_s20 = smov 0   ;;  %s967_s21 = smov 0  }
   0x8   :  { %s969_s22 = smov 0   ;;  %s971_s23 = smov 0  }
   0x9 LB: > { %s992_s24 = sadd.s32 4294967295, %s918_s23   ;;  %s1269_s25 = sadd.s32 4294967294, %s918_s23   ;;  %s918_s23 = sphi %s971_s23, %s26_s23   ;;  %s914_s22 = sphi %s969_s22, %s1289_s22   ;;  %s910_s21 = sphi %s967_s21, %s1288_s21   ;;  %s906_s20 = sphi %s965_s20, %s1287_s20   ;;  %s902_s19 = sphi %s963_s19, %s1286_s19   ;;  %s898_s18 = sphi %s961_s18, %s1285_s18  }
   0xa   : > { %p60_p0 = scmp.ne.s32.totalorder %s902_s19, %s898_s18  ;;  %p1266_p1 = scmp.eq.s32.totalorder %s992_s24, 0 }
   0xb   : > { %p134_p3 = scmp.eq.s32.totalorder %s1269_s25, 1  ;;  %p587_p5 = scmp.ge.s32.totalorder %s918_s23, 1 }
   0xc   : > { %p1003_p4 = por %p1266_p1, %p60_p0  ;;  %p197_p7 = scmp.lt.s32.totalorder %s918_s23, 3 }
   0xd   : > { %p1008_p6 = por %p134_p3, %p60_p0  ;;  %s920_s29 = smov [#allocation5]  }
   0xe   : > { %s1270_s26 = scalar_select %p1003_p4, 1, 0 }
   0xf   : > { %s1271_s27 = scalar_select %p1008_p6, 1, 0 }
  0x10   : > { %p1013_p8 = pnand %p587_p5, %p197_p7  ;;  %s209_s30 = sshll.u32 %s920_s29, 4  ;;  %s210_s30 = int_to_ptr.vmem [resolvable:$true] %s209_s30 }
  0x11   : > { %s38_s7 = sadd.s32 1, %s914_s22  ;;  %s714_s10 = scalar_lea.hbm %s1261_s1, 256 }
  0x12   : > { %s1272_s28 = scalar_select %p1013_p8, 1, 0 }
  0x13   : > { %p635_p9 = pneg %p1013_p8  ;;  %p715_p12 = scmp.ne.s32.totalorder %s1261_s1, %s714_s10 }
  0x14   : > { %p721_p5 = scmp.lt.u32.totalorder %s714_s10, %s1261_s1 }
  0x15   : > { %p1022_p11 = pnand %p635_p9, %p1266_p1 }
  0x17   : > { %p716_p13 = pneg %p1022_p11 }
  0x19   : > { %p717_p0 = pnand %p716_p13, %p715_p12 }
  0x1b   : > { %p718_p3 = pneg %p717_p0 }
  0x1d   : > { %p723_p7 = pnand %p721_p5, %p718_p3 }
  0x1f   : > { %726 = shalt.err (!%p723_p7)
}
  0x20   : > { %s727_s15 = scalar_lea.vmem %s210_s30, 256  ;;  %p735_p2 = scmp.lt.s32.totalorder %s210_s30, %s210_s30 }
  0x21   : > { %p728_p9 = scmp.ne.s32.totalorder %s210_s30, %s727_s15  ;;  %p736_p6 = scmp.lt.s32.totalorder %s727_s15, %s727_s15 }
  0x23   : > { %p730_p10 = pnand %p728_p9, %p716_p13  ;;  %p737_p4 = por %p736_p6, %p735_p2 }
  0x25   : > { %p731_p1 = pneg %p730_p10 }
  0x27   : > { %p738_p8 = pnand %p737_p4, %p731_p1 }
  0x29   : > { %741 = shalt.err (!%p738_p8)
}
  0x2a   : > { %s921_s16 = smov 64   ;;  %s922_s17 = smov 4  }
  0x2b   : > { %638 = dma.hbm_to_vmem [thread:$0]  (!%p1022_p11), %s1261_s1, 256, %s210_s30, [#allocation6], %s921_s16, %s921_s16, %s922_s17  }
  0x2c   : > { %p40_p1 = scmp.ge.s32.totalorder %s38_s7, 2  ;;  %s47_s9 = sadd.s32 1, %s906_s20 }
  0x2d   : > { %p54_p2 = scmp.ne.s32.totalorder %s906_s20, %s902_s19  ;;  %p55_p4 = scmp.eq.s32.totalorder %s918_s23, 0 }
  0x2e   : > { %s1291_s7 = smov (%p40_p1, %s38_s7), 0  ;;  %p1275_p8 = scmp.eq.s32.totalorder %s992_s24, 1 }
  0x2f   : > { %p1049_p6 = por %p55_p4, %p54_p2  ;;  %s42_s6 = ssub.s32 %s914_s22, %s1291_s7 }
  0x30   : > { %p1055_p10 = por %p1275_p8, %p54_p2  ;;  %p654_p12 = scmp.lt.s32.totalorder %s918_s23, 2 }
  0x31   : > { %p45_p11 = scmp.eq.s32.totalorder %s42_s6, 0  ;;  %s226_s30 = sand.u32 1, %s906_s20  }
  0x32   : > { %s590_s12 = sshll.u32 %s226_s30, 2  ;;  %s591_s14 = sshll.u32 %s914_s22, 6 }
  0x33   : > { %s1064_s13 = scalar_select %p45_p11, %s906_s20, %s47_s9  }
  0x34   : > { %s1070_s17 = scalar_lea.hbm %s1260_s0, %s591_s14  ;;  %s230_s29 = scalar_lea.vmem [#allocation2], %s590_s12 }
  0x35   : > { %s238_s8 = sshll.u32 %s230_s29, 4  ;;  %p1076_p13 = pnand %p654_p12, %p1049_p6  ;;  %s1072_s8 = int_to_ptr.vmem [resolvable:$true] %s238_s8 }
  0x36   : > { %s227_s9 = scalar_lea.sflag [#allocation3], %s226_s30  ;;  %s742_s25 = scalar_lea.hbm %s1070_s17, 64 }
  0x37   : > { %p743_p0 = scmp.ne.s32.totalorder %s1070_s17, %s742_s25  ;;  %p744_p3 = pneg %p1076_p13 }
  0x38   : > { %s747_s15 = scalar_lea.hbm %s1260_s0, 128  ;;  %p748_p9 = scmp.lt.u32.totalorder %s1070_s17, %s1260_s0 }
  0x39   : > { %p745_p5 = pnand %p744_p3, %p743_p0  ;;  %p749_p1 = scmp.lt.u32.totalorder %s747_s15, %s742_s25 }
  0x3a   : > { %p751_p4 = scmp.lt.u32.totalorder %s742_s25, %s1070_s17 }
  0x3b   : > { %p746_p7 = pneg %p745_p5  ;;  %p750_p2 = por %p749_p1, %p748_p9 }
  0x3d   : > { %p752_p6 = por %p751_p4, %p750_p2 }
  0x3f   : > { %p753_p8 = pnand %p752_p6, %p746_p7 }
  0x41   : > { %756 = shalt.err (!%p753_p8)
}
  0x42   : > { %s757_s30 = scalar_lea.vmem %s1072_s8, 64  ;;  %s923_s29 = smov [#allocation2]  }
  0x43   : > { %p758_p12 = scmp.ne.s32.totalorder %s1072_s8, %s757_s30  ;;  %s762_s12 = sshll.u32 %s923_s29, 4  ;;  %s763_s12 = int_to_ptr.vmem [resolvable:$false] %s762_s12 }
  0x44   : > { %s764_s14 = scalar_lea.vmem %s763_s12, 128  ;;  %p765_p5 = scmp.lt.s32.totalorder %s1072_s8, %s763_s12 }
  0x45   : > { %p760_p11 = pnand %p758_p12, %p744_p3  ;;  %p766_p9 = scmp.lt.s32.totalorder %s764_s14, %s757_s30 }
  0x47   : > { %p761_p0 = pneg %p760_p11  ;;  %p767_p1 = por %p766_p9, %p765_p5 }
  0x49   : > { %p768_p2 = pnand %p767_p1, %p761_p0 }
  0x4b   : > { %771 = shalt.err (!%p768_p2)
}
  0x4c   : > { %642 = dma.hbm_to_vmem [thread:$0]  (!%p1076_p13), %s1070_s17, 64, %s1072_s8, %s227_s9  }
  0x4d   : > { %p1278_p7 = scmp.ne.s32.totalorder %s1272_s28, 0 }
  0x4e   : > { %s1108_s25 = sand.u32 (!%p1278_p7), 1, %s902_s19   ;;  %p1279_p3 = scmp.ne.s32.totalorder (!%p1278_p7), %s1270_s26, 0 }
  0x4f   : > { %247 = sbr.rel (%p1278_p7) target bundleno = 467 (0x1d3), region = 32  ;;  %s1111_s15 = sshll.u32 (!%p1278_p7), %s1108_s25, 2 }
  0x50   : > { %s250_s10 = scalar_lea.sflag (!%p1278_p7), [#allocation3], %s1108_s25  ;;  %s253_s16 = scalar_lea.vmem (!%p1278_p7), [#allocation2], %s1111_s15 }
  0x56   : > { %881 = dma.done.wait (%p1279_p3), %s250_s10, 64  }
  0x57   : > { %883 = vsyncadd (%p1279_p3), %s250_s10, 4294967232  ;;  %p1280_p13 = scmp.eq.s32.totalorder %s992_s24, 0 }
  0x59   : > { %885 = dma.done.wait (%p1280_p13), [#allocation6], 256   ;;  %p1281_p4 = pmov %p1280_p13 }
  0x5a   : > { %v924_v0 = vmov 0.0   ;;  %vm925_vm0 = vmmov 0   ;;  %v712_v1 = vld [vmem:[#allocation5] sm:$0xff]   ;;  %v713_v2 = vld [vmem:[#allocation5 + $0x8] sm:$0xff]   ;;  %v295_v3 = vld [vmem:[%s253_s16] sm:$0xf] }
  0x5b   : > { %887 = vsyncadd (%p1281_p4), [#allocation6], 4294967040  ;;  %615 = vmatprep.subr.bf16.mxu0 %v924_v0  ;;  %619 = vmatprep.mubr.msk.bf16.mxu0 %vm925_vm0, %v924_v0  ;;  %vm319_vm1 = vcmask 261120   ;;  %v598_v4 = vld [vmem:[%s1262_s2] ss:$0 sm:$0xff]  ;;  %s1127_s17 = sshll.u32 %s910_s21, 6 }
  0x5c   : > { %616 = vmatpush3.bf16.msra.mxu0 %v712_v1  ;;  %s279_s8 = scalar_lea.vmem [#allocation7], %s1111_s15  ;;  %vm365_vm2 = vcmask 257024   ;;  %s926_s9 = smov 96  }
  0x5d   : > { %617 = vmatprep.subr.bf16.mxu0 %v924_v0  ;;  %s404_s6 = sshll.u32 %s279_s8, 4  ;;  %s1134_s12 = scalar_lea.hbm %s1263_s3, %s1127_s17  ;;  %s1136_s6 = int_to_ptr.vmem [resolvable:$true] %s404_s6 }
  0x5e   : > { %s380_s21 = scalar_lea.sflag [#allocation4], %s1108_s25  ;;  %s772_s14 = scalar_lea.vmem %s1136_s6, 64 }
  0x5f   : > { %p773_p6 = scmp.ne.s32.totalorder %s1136_s6, %s772_s14  ;;  %s927_s10 = smov [#allocation7]  }
  0x60   : > { %618 = vmatpush3.bf16.msra.mxu0 %v713_v2  ;;  %s776_s16 = sshll.u32 %s927_s10, 4  ;;  %s777_s16 = int_to_ptr.vmem [resolvable:$false] %s776_s16 }
  0x61   : > { %p774_p8 = pnand %p773_p6, %p1055_p10  ;;  %s778_s26 = scalar_lea.vmem %s777_s16, 128 }
  0x62   : > { %p779_p11 = scmp.lt.s32.totalorder %s1136_s6, %s777_s16  ;;  %p780_p0 = scmp.lt.s32.totalorder %s778_s26, %s772_s14 }
  0x63   : > { %620 = vmatmul.mubr.msk.bf16.vlgmr.msra.gmra.mrb[0].mxu0 %vm319_vm1, %v295_v3  ;;  %p775_p12 = pneg %p774_p8 }
  0x64   : > { %p781_p5 = por %p780_p0, %p779_p11 }
  0x66   : > { %p782_p9 = pnand %p781_p5, %p775_p12 }
 0x136   : > { %v357_v5 = vpop.f32.mrb[0].mxu0 }
 0x137   : > { %v358_v6 = vadd.f32 %v598_v4, %v357_v5  ;;  %v621_v7 = vpop.f32.mrb[1].mxu0 }
 0x138   : > { %v360_v8 = vpop.f32.mrb[2].mxu0 }
 0x139   : > { %v363_v9 = vmul.f32 0.35355338, %v358_v6  ;;  %v622_v10 = vpop.f32.mrb[3].mxu0  ;;  %v611_v11 = vpack.c.bf16 %v358_v6, %v358_v6 }
 0x13b   : > { %v364_v12 = vpack.c.bf16 %v363_v9, %v363_v9  ;;  %371 = vrot.lane.b32.xlu0 %v611_v11, %s926_s9 }
 0x13d   : > { %366 = vst.msk [vmem:[%s279_s8] sm:$0xf] %vm365_vm2, %v364_v12 }
 0x13e   : > { %785 = shalt.err (!%p782_p9)
}
 0x13f   : > { %s786_s25 = scalar_lea.hbm %s1134_s12, 64  ;;  %s790_s9 = scalar_lea.hbm %s1263_s3, 128 }
 0x140   : > { %p787_p1 = scmp.ne.s32.totalorder %s1134_s12, %s786_s25  ;;  %p791_p3 = scmp.lt.u32.totalorder %s1134_s12, %s1263_s3 }
 0x141   : > { %p792_p13 = scmp.lt.u32.totalorder %s790_s9, %s786_s25  ;;  %p794_p6 = scmp.lt.u32.totalorder %s786_s25, %s1134_s12 }
 0x142   : > { %p788_p2 = pnand %p787_p1, %p1055_p10 }
 0x143   : > { %p793_p4 = por %p792_p13, %p791_p3 }
 0x144   : > { %p789_p7 = pneg %p788_p2 }
 0x145   : > { %p795_p8 = por %p794_p6, %p793_p4 }
 0x147   : > { %p796_p12 = pnand %p795_p8, %p789_p7 }
 0x149   : > { %799 = shalt.err (!%p796_p12)
}
 0x14a   : > { %629 = dma.vmem_to_hbm [thread:$0]  (%p1055_p10), %s1136_s6, 64, %s1134_s12, %s380_s21  }
 0x14b   : > { %s928_s14 = smov 64   ;;  %s384_s10 = sand.u32 1, %s992_s24  }
 0x14c   : > { %375 = vrot.lane.b32.xlu0 %v611_v11, %s928_s14  ;;  %s286_s16 = scalar_lea.vmem [#allocation8], %s1111_s15  ;;  %s1167_s8 = scalar_lea.hbm %s1264_s4, %s1127_s17 }
 0x14d   : > { %s418_s26 = sshll.u32 %s286_s16, 4  ;;  %s293_s9 = scalar_lea.vmem [#allocation10], %s1111_s15  ;;  %s1169_s26 = int_to_ptr.vmem [resolvable:$true] %s418_s26 }
 0x14e   : > { %s1174_s30 = sshll.u32 %s293_s9, 4  ;;  %s1177_s24 = scalar_lea.sflag [#allocation9], %s384_s10  ;;  %s1208_s30 = int_to_ptr.vmem [resolvable:$true] %s1174_s30 }
 0x14f   : > { %s800_s6 = scalar_lea.vmem %s1169_s26, 64  ;;  %s929_s12 = smov [#allocation8]  }
 0x150   : > { %p801_p11 = scmp.ne.s32.totalorder %s1169_s26, %s800_s6  ;;  %s804_s21 = sshll.u32 %s929_s12, 4  ;;  %s805_s21 = int_to_ptr.vmem [resolvable:$false] %s804_s21 }
 0x151   : > { %s806_s29 = scalar_lea.vmem %s805_s21, 128  ;;  %p807_p9 = scmp.lt.s32.totalorder %s1169_s26, %s805_s21 }
 0x152   : > { %p802_p0 = pnand %p801_p11, %p1055_p10  ;;  %p808_p1 = scmp.lt.s32.totalorder %s806_s29, %s800_s6 }
 0x154   : > { %p803_p5 = pneg %p802_p0  ;;  %p809_p2 = por %p808_p1, %p807_p9 }
 0x156   : > { %p810_p7 = pnand %p809_p2, %p803_p5 }
 0x1ad   : > { %v372_v13 = vpop.permute.xlu0 %371 }
 0x1ae   : > { %374 = vst.msk [vmem:[%s286_s16] sm:$0xf] %vm365_vm2, %v372_v13 }
 0x1af   : > { %813 = shalt.err (!%p810_p7)
}
 0x1b0   : > { %s814_s14 = scalar_lea.hbm %s1167_s8, 64  ;;  %s818_s25 = scalar_lea.hbm %s1264_s4, 128 }
 0x1b1   : > { %p815_p3 = scmp.ne.s32.totalorder %s1167_s8, %s814_s14  ;;  %p819_p6 = scmp.lt.u32.totalorder %s1167_s8, %s1264_s4 }
 0x1b2   : > { %p820_p8 = scmp.lt.u32.totalorder %s818_s25, %s814_s14  ;;  %p822_p11 = scmp.lt.u32.totalorder %s814_s14, %s1167_s8 }
 0x1b3   : > { %p816_p13 = pnand %p815_p3, %p1055_p10 }
 0x1b4   : > { %p821_p12 = por %p820_p8, %p819_p6 }
 0x1b5   : > { %p817_p4 = pneg %p816_p13 }
 0x1b6   : > { %p823_p0 = por %p822_p11, %p821_p12 }
 0x1b8   : > { %p824_p5 = pnand %p823_p0, %p817_p4 }
 0x1ba   : > { %827 = shalt.err (!%p824_p5)
}
 0x1bb   : > { %630 = dma.vmem_to_hbm [thread:$0]  (%p1055_p10), %s1169_s26, 64, %s1167_s8, %s1177_s24  }
 0x1bc   : > { %s1205_s29 = scalar_lea.hbm %s1265_s5, %s1127_s17  ;;  %s828_s14 = scalar_lea.vmem %s1208_s30, 64 }
 0x1bd   : > { %p829_p9 = scmp.ne.s32.totalorder %s1208_s30, %s828_s14  ;;  %s930_s26 = smov [#allocation10]  }
 0x1be   : > { %v376_v14 = vpop.permute.xlu0 %375  ;;  %s832_s8 = sshll.u32 %s930_s26, 4  ;;  %s833_s8 = int_to_ptr.vmem [resolvable:$false] %s832_s8 }
 0x1bf   : > { %378 = vst.msk [vmem:[%s293_s9] sm:$0xf] %vm365_vm2, %v376_v14  ;;  %p830_p1 = pnand %p829_p9, %p1055_p10  ;;  %s834_s10 = scalar_lea.vmem %s833_s8, 128 }
 0x1c0   : > { %p835_p7 = scmp.lt.s32.totalorder %s1208_s30, %s833_s8  ;;  %p836_p3 = scmp.lt.s32.totalorder %s834_s10, %s828_s14 }
 0x1c1   : > { %p831_p2 = pneg %p830_p1 }
 0x1c2   : > { %p837_p13 = por %p836_p3, %p835_p7 }
 0x1c4   : > { %p838_p4 = pnand %p837_p13, %p831_p2 }
 0x1c6   : > { %841 = shalt.err (!%p838_p4)
}
 0x1c7   : > { %s842_s15 = scalar_lea.hbm %s1205_s29, 64  ;;  %s846_s16 = scalar_lea.hbm %s1265_s5, 128 }
 0x1c8   : > { %p843_p6 = scmp.ne.s32.totalorder %s1205_s29, %s842_s15  ;;  %p847_p11 = scmp.lt.u32.totalorder %s1205_s29, %s1265_s5 }
 0x1c9   : > { %p848_p0 = scmp.lt.u32.totalorder %s846_s16, %s842_s15  ;;  %p850_p9 = scmp.lt.u32.totalorder %s842_s15, %s1205_s29 }
 0x1ca   : > { %p844_p8 = pnand %p843_p6, %p1055_p10 }
 0x1cb   : > { %p849_p5 = por %p848_p0, %p847_p11 }
 0x1cc   : > { %p845_p12 = pneg %p844_p8 }
 0x1cd   : > { %p851_p1 = por %p850_p9, %p849_p5 }
 0x1cf   : > { %p852_p2 = pnand %p851_p1, %p845_p12 }
 0x1d1   : > { %855 = shalt.err (!%p852_p2)
}
 0x1d2   : > { %631 = dma.vmem_to_hbm [thread:$0]  (%p1055_p10), %s1208_s30, 64, %s1205_s29, %s1177_s24  }
 0x1d3 PF: > { %s444_s12 = sand.u32 1, %s898_s18   ;;  %p1282_p7 = scmp.ne.s32.totalorder %s1271_s27, 0 }
 0x1d4   : > { %p1283_p3 = scmp.ge.s32.totalorder %s918_s23, 2  ;;  %s445_s6 = scalar_lea.sflag [#allocation4], %s444_s12 }
 0x1d6   : > { %p644_p13 = pnand %p1283_p3, %p1282_p7 }
 0x1d8   : > { %889 = dma.done.wait (!%p644_p13), %s445_s6, 64  }
 0x1d9   : > { %891 = vsyncadd (!%p644_p13), %s445_s6, 4294967232  ;;  %s1284_s21 = sadd.s32 4294967294, %s918_s23  }
 0x1da   : > { %s453_s14 = sand.u32 1, %s1284_s21  }
 0x1db   : > { %s454_s26 = scalar_lea.sflag [#allocation9], %s453_s14 }
 0x1dc   : > { %893 = dma.done.wait (!%p644_p13), %s454_s26, 128  }
 0x1dd   : > { %895 = vsyncadd (!%p644_p13), %s454_s26, 4294967168  ;;  %s26_s23 = sadd.s32 1, %s918_s23   ;;  %s1285_s18 = smov %s902_s19 }
 0x1de   : > { %p23_p10 = scmp.ge.s32.totalorder %s26_s23, 4   ;;  %s1286_s19 = smov %s906_s20 }
 0x1df   : > { %s1287_s20 = smov %s1064_s13  ;;  %s1288_s21 = smov %s914_s22 }
 0x1e0   : > { %s1289_s22 = smov %s1291_s7  ;;  %25 = sbr.rel (!%p23_p10) target bundleno = 9 (0x9), region = 113 }
 0x1e7   :  { %468 = vsyncpa [#allocation3], 1 }
 0x1e8   :  { %470 = vsyncpa [#allocation3 + $0x1], 1 }
 0x1e9   :  { %471 = vsyncpa [#allocation6], 1 }
 0x1ea   :  { %472 = vsyncpa [#allocation4], 1 }
 0x1eb   :  { %474 = vsyncpa [#allocation4 + $0x1], 1 }
 0x1ec   :  { %475 = vsyncpa [#allocation9], 1 }
 0x1ed   :  { %477 = vsyncpa [#allocation9 + $0x1], 1 }

// kernel: tpu_custom_call.1
= control target key start
LH: loop header
LB: loop body
LE: loop exit
PB: predicated region body
PF: predicated region fallthrough
CT: control target
= control target key end

     0   :  { %11 = vsyncpa [#allocation3], 0  ;;  %s1260_s0 = inlined_call_operand.hbm [shape: bf16[2,8,32], index: 0, kind: input, shape index: {}]   ;;  %s1261_s1 = inlined_call_operand.hbm [shape: bf16[32,96], index: 1, kind: input, shape index: {}]   ;;  %s1262_s2 = inlined_call_operand.vmem [shape: f32[1,96], index: 2, kind: input, shape index: {}]   ;;  %s1263_s3 = inlined_call_operand.hbm [shape: bf16[2,8,32], index: 3, kind: output, shape index: {0}]   ;;  %s1264_s4 = inlined_call_operand.hbm [shape: bf16[2,8,32], index: 4, kind: output, shape index: {1}]   ;;  %s1265_s5 = inlined_call_operand.hbm [shape: bf16[2,8,32], index: 5, kind: output, shape index: {2}]  }
   0x1   :  { %13 = vsyncpa [#allocation3 + $0x1], 0 }
   0x2   :  { %14 = vsyncpa [#allocation6], 0 }
   0x3   :  { %15 = vsyncpa [#allocation4], 0 }
   0x4   :  { %17 = vsyncpa [#allocation4 + $0x1], 0 }
   0x5   :  { %18 = vsyncpa [#allocation9], 0 }
   0x6   :  { %20 = vsyncpa [#allocation9 + $0x1], 0  ;;  %s961_s18 = smov 0   ;;  %s963_s19 = smov 0  }
   0x7   :  { %s965_s20 = smov 0   ;;  %s967_s21 = smov 0  }
   0x8   :  { %s969_s22 = smov 0   ;;  %s971_s23 = smov 0  }
   0x9 LB: > { %s992_s24 = sadd.s32 4294967295, %s918_s23   ;;  %s1269_s25 = sadd.s32 4294967294, %s918_s23   ;;  %s918_s23 = sphi %s971_s23, %s26_s23   ;;  %s914_s22 = sphi %s969_s22, %s1289_s22   ;;  %s910_s21 = sphi %s967_s21, %s1288_s21   ;;  %s906_s20 = sphi %s965_s20, %s1287_s20   ;;  %s902_s19 = sphi %s963_s19, %s1286_s19   ;;  %s898_s18 = sphi %s961_s18, %s1285_s18  }
   0xa   : > { %p60_p0 = scmp.ne.s32.totalorder %s902_s19, %s898_s18  ;;  %p1266_p1 = scmp.eq.s32.totalorder %s992_s24, 0 }
   0xb   : > { %p134_p3 = scmp.eq.s32.totalorder %s1269_s25, 1  ;;  %p587_p5 = scmp.ge.s32.totalorder %s918_s23, 1 }
   0xc   : > { %p1003_p4 = por %p1266_p1, %p60_p0  ;;  %p197_p7 = scmp.lt.s32.totalorder %s918_s23, 3 }
   0xd   : > { %p1008_p6 = por %p134_p3, %p60_p0  ;;  %s920_s29 = smov [#allocation5]  }
   0xe   : > { %s1270_s26 = scalar_select %p1003_p4, 1, 0 }
   0xf   : > { %s1271_s27 = scalar_select %p1008_p6, 1, 0 }
  0x10   : > { %p1013_p8 = pnand %p587_p5, %p197_p7  ;;  %s209_s30 = sshll.u32 %s920_s29, 4  ;;  %s210_s30 = int_to_ptr.vmem [resolvable:$true] %s209_s30 }
  0x11   : > { %s38_s7 = sadd.s32 1, %s914_s22  ;;  %s714_s10 = scalar_lea.hbm %s1261_s1, 256 }
  0x12   : > { %s1272_s28 = scalar_select %p1013_p8, 1, 0 }
  0x13   : > { %p635_p9 = pneg %p1013_p8  ;;  %p715_p12 = scmp.ne.s32.totalorder %s1261_s1, %s714_s10 }
  0x14   : > { %p721_p5 = scmp.lt.u32.totalorder %s714_s10, %s1261_s1 }
  0x15   : > { %p1022_p11 = pnand %p635_p9, %p1266_p1 }
  0x17   : > { %p716_p13 = pneg %p1022_p11 }
  0x19   : > { %p717_p0 = pnand %p716_p13, %p715_p12 }
  0x1b   : > { %p718_p3 = pneg %p717_p0 }
  0x1d   : > { %p723_p7 = pnand %p721_p5, %p718_p3 }
  0x1f   : > { %726 = shalt.err (!%p723_p7)
}
  0x20   : > { %s727_s15 = scalar_lea.vmem %s210_s30, 256  ;;  %p735_p2 = scmp.lt.s32.totalorder %s210_s30, %s210_s30 }
  0x21   : > { %p728_p9 = scmp.ne.s32.totalorder %s210_s30, %s727_s15  ;;  %p736_p6 = scmp.lt.s32.totalorder %s727_s15, %s727_s15 }
  0x23   : > { %p730_p10 = pnand %p728_p9, %p716_p13  ;;  %p737_p4 = por %p736_p6, %p735_p2 }
  0x25   : > { %p731_p1 = pneg %p730_p10 }
  0x27   : > { %p738_p8 = pnand %p737_p4, %p731_p1 }
  0x29   : > { %741 = shalt.err (!%p738_p8)
}
  0x2a   : > { %s921_s16 = smov 64   ;;  %s922_s17 = smov 4  }
  0x2b   : > { %638 = dma.hbm_to_vmem [thread:$0]  (!%p1022_p11), %s1261_s1, 256, %s210_s30, [#allocation6], %s921_s16, %s921_s16, %s922_s17  }
  0x2c   : > { %p40_p1 = scmp.ge.s32.totalorder %s38_s7, 2  ;;  %s47_s9 = sadd.s32 1, %s906_s20 }
  0x2d   : > { %p54_p2 = scmp.ne.s32.totalorder %s906_s20, %s902_s19  ;;  %p55_p4 = scmp.eq.s32.totalorder %s918_s23, 0 }
  0x2e   : > { %s1291_s7 = smov (%p40_p1, %s38_s7), 0  ;;  %p1275_p8 = scmp.eq.s32.totalorder %s992_s24, 1 }
  0x2f   : > { %p1049_p6 = por %p55_p4, %p54_p2  ;;  %s42_s6 = ssub.s32 %s914_s22, %s1291_s7 }
  0x30   : > { %p1055_p10 = por %p1275_p8, %p54_p2  ;;  %p654_p12 = scmp.lt.s32.totalorder %s918_s23, 2 }
  0x31   : > { %p45_p11 = scmp.eq.s32.totalorder %s42_s6, 0  ;;  %s226_s30 = sand.u32 1, %s906_s20  }
  0x32   : > { %s590_s12 = sshll.u32 %s226_s30, 2  ;;  %s591_s14 = sshll.u32 %s914_s22, 6 }
  0x33   : > { %s1064_s13 = scalar_select %p45_p11, %s906_s20, %s47_s9  }
  0x34   : > { %s1070_s17 = scalar_lea.hbm %s1260_s0, %s591_s14  ;;  %s230_s29 = scalar_lea.vmem [#allocation2], %s590_s12 }
  0x35   : > { %s238_s8 = sshll.u32 %s230_s29, 4  ;;  %p1076_p13 = pnand %p654_p12, %p1049_p6  ;;  %s1072_s8 = int_to_ptr.vmem [resolvable:$true] %s238_s8 }
  0x36   : > { %s227_s9 = scalar_lea.sflag [#allocation3], %s226_s30  ;;  %s742_s25 = scalar_lea.hbm %s1070_s17, 64 }
  0x37   : > { %p743_p0 = scmp.ne.s32.totalorder %s1070_s17, %s742_s25  ;;  %p744_p3 = pneg %p1076_p13 }
  0x38   : > { %s747_s15 = scalar_lea.hbm %s1260_s0, 128  ;;  %p748_p9 = scmp.lt.u32.totalorder %s1070_s17, %s1260_s0 }
  0x39   : > { %p745_p5 = pnand %p744_p3, %p743_p0  ;;  %p749_p1 = scmp.lt.u32.totalorder %s747_s15, %s742_s25 }
  0x3a   : > { %p751_p4 = scmp.lt.u32.totalorder %s742_s25, %s1070_s17 }
  0x3b   : > { %p746_p7 = pneg %p745_p5  ;;  %p750_p2 = por %p749_p1, %p748_p9 }
  0x3d   : > { %p752_p6 = por %p751_p4, %p750_p2 }
  0x3f   : > { %p753_p8 = pnand %p752_p6, %p746_p7 }
  0x41   : > { %756 = shalt.err (!%p753_p8)
}
  0x42   : > { %s757_s30 = scalar_lea.vmem %s1072_s8, 64  ;;  %s923_s29 = smov [#allocation2]  }
  0x43   : > { %p758_p12 = scmp.ne.s32.totalorder %s1072_s8, %s757_s30  ;;  %s762_s12 = sshll.u32 %s923_s29, 4  ;;  %s763_s12 = int_to_ptr.vmem [resolvable:$false] %s762_s12 }
  0x44   : > { %s764_s14 = scalar_lea.vmem %s763_s12, 128  ;;  %p765_p5 = scmp.lt.s32.totalorder %s1072_s8, %s763_s12 }
  0x45   : > { %p760_p11 = pnand %p758_p12, %p744_p3  ;;  %p766_p9 = scmp.lt.s32.totalorder %s764_s14, %s757_s30 }
  0x47   : > { %p761_p0 = pneg %p760_p11  ;;  %p767_p1 = por %p766_p9, %p765_p5 }
  0x49   : > { %p768_p2 = pnand %p767_p1, %p761_p0 }
  0x4b   : > { %771 = shalt.err (!%p768_p2)
}
  0x4c   : > { %642 = dma.hbm_to_vmem [thread:$0]  (!%p1076_p13), %s1070_s17, 64, %s1072_s8, %s227_s9  }
  0x4d   : > { %p1278_p7 = scmp.ne.s32.totalorder %s1272_s28, 0 }
  0x4e   : > { %s1108_s25 = sand.u32 (!%p1278_p7), 1, %s902_s19   ;;  %p1279_p3 = scmp.ne.s32.totalorder (!%p1278_p7), %s1270_s26, 0 }
  0x4f   : > { %247 = sbr.rel (%p1278_p7) target bundleno = 467 (0x1d3), region = 32  ;;  %s1111_s15 = sshll.u32 (!%p1278_p7), %s1108_s25, 2 }
  0x50   : > { %s250_s10 = scalar_lea.sflag (!%p1278_p7), [#allocation3], %s1108_s25  ;;  %s253_s16 = scalar_lea.vmem (!%p1278_p7), [#allocation2], %s1111_s15 }
  0x56   : > { %881 = dma.done.wait (%p1279_p3), %s250_s10, 64  }
  0x57   : > { %883 = vsyncadd (%p1279_p3), %s250_s10, 4294967232  ;;  %p1280_p13 = scmp.eq.s32.totalorder %s992_s24, 0 }
  0x59   : > { %885 = dma.done.wait (%p1280_p13), [#allocation6], 256   ;;  %p1281_p4 = pmov %p1280_p13 }
  0x5a   : > { %v924_v0 = vmov 0.0   ;;  %vm925_vm0 = vmmov 0   ;;  %v712_v1 = vld [vmem:[#allocation5] sm:$0xff]   ;;  %v713_v2 = vld [vmem:[#allocation5 + $0x8] sm:$0xff]   ;;  %v295_v3 = vld [vmem:[%s253_s16] sm:$0xf] }
  0x5b   : > { %887 = vsyncadd (%p1281_p4), [#allocation6], 4294967040  ;;  %615 = vmatprep.subr.bf16.mxu0 %v924_v0  ;;  %619 = vmatprep.mubr.msk.bf16.mxu0 %vm925_vm0, %v924_v0  ;;  %vm319_vm1 = vcmask 261120   ;;  %v598_v4 = vld [vmem:[%s1262_s2] ss:$0 sm:$0xff]  ;;  %s1127_s17 = sshll.u32 %s910_s21, 6 }
  0x5c   : > { %616 = vmatpush3.bf16.msra.mxu0 %v712_v1  ;;  %s279_s8 = scalar_lea.vmem [#allocation7], %s1111_s15  ;;  %vm365_vm2 = vcmask 257024   ;;  %s926_s9 = smov 96  }
  0x5d   : > { %617 = vmatprep.subr.bf16.mxu0 %v924_v0  ;;  %s404_s6 = sshll.u32 %s279_s8, 4  ;;  %s1134_s12 = scalar_lea.hbm %s1263_s3, %s1127_s17  ;;  %s1136_s6 = int_to_ptr.vmem [resolvable:$true] %s404_s6 }
  0x5e   : > { %s380_s21 = scalar_lea.sflag [#allocation4], %s1108_s25  ;;  %s772_s14 = scalar_lea.vmem %s1136_s6, 64 }
  0x5f   : > { %p773_p6 = scmp.ne.s32.totalorder %s1136_s6, %s772_s14  ;;  %s927_s10 = smov [#allocation7]  }
  0x60   : > { %618 = vmatpush3.bf16.msra.mxu0 %v713_v2  ;;  %s776_s16 = sshll.u32 %s927_s10, 4  ;;  %s777_s16 = int_to_ptr.vmem [resolvable:$false] %s776_s16 }
  0x61   : > { %p774_p8 = pnand %p773_p6, %p1055_p10  ;;  %s778_s26 = scalar_lea.vmem %s777_s16, 128 }
  0x62   : > { %p779_p11 = scmp.lt.s32.totalorder %s1136_s6, %s777_s16  ;;  %p780_p0 = scmp.lt.s32.totalorder %s778_s26, %s772_s14 }
  0x63   : > { %620 = vmatmul.mubr.msk.bf16.vlgmr.msra.gmra.mrb[0].mxu0 %vm319_vm1, %v295_v3  ;;  %p775_p12 = pneg %p774_p8 }
  0x64   : > { %p781_p5 = por %p780_p0, %p779_p11 }
  0x66   : > { %p782_p9 = pnand %p781_p5, %p775_p12 }
 0x136   : > { %v357_v5 = vpop.f32.mrb[0].mxu0 }
 0x137   : > { %v358_v6 = vadd.f32 %v598_v4, %v357_v5  ;;  %v621_v7 = vpop.f32.mrb[1].mxu0 }
 0x138   : > { %v360_v8 = vpop.f32.mrb[2].mxu0 }
 0x139   : > { %v363_v9 = vmul.f32 0.35355338, %v358_v6  ;;  %v622_v10 = vpop.f32.mrb[3].mxu0  ;;  %v611_v11 = vpack.c.bf16 %v358_v6, %v358_v6 }
 0x13b   : > { %v364_v12 = vpack.c.bf16 %v363_v9, %v363_v9  ;;  %371 = vrot.lane.b32.xlu0 %v611_v11, %s926_s9 }
 0x13d   : > { %366 = vst.msk [vmem:[%s279_s8] sm:$0xf] %vm365_vm2, %v364_v12 }
 0x13e   : > { %785 = shalt.err (!%p782_p9)
}
 0x13f   : > { %s786_s25 = scalar_lea.hbm %s1134_s12, 64  ;;  %s790_s9 = scalar_lea.hbm %s1263_s3, 128 }
 0x140   : > { %p787_p1 = scmp.ne.s32.totalorder %s1134_s12, %s786_s25  ;;  %p791_p3 = scmp.lt.u32.totalorder %s1134_s12, %s1263_s3 }
 0x141   : > { %p792_p13 = scmp.lt.u32.totalorder %s790_s9, %s786_s25  ;;  %p794_p6 = scmp.lt.u32.totalorder %s786_s25, %s1134_s12 }
 0x142   : > { %p788_p2 = pnand %p787_p1, %p1055_p10 }
 0x143   : > { %p793_p4 = por %p792_p13, %p791_p3 }
 0x144   : > { %p789_p7 = pneg %p788_p2 }
 0x145   : > { %p795_p8 = por %p794_p6, %p793_p4 }
 0x147   : > { %p796_p12 = pnand %p795_p8, %p789_p7 }
 0x149   : > { %799 = shalt.err (!%p796_p12)
}
 0x14a   : > { %629 = dma.vmem_to_hbm [thread:$0]  (%p1055_p10), %s1136_s6, 64, %s1134_s12, %s380_s21  }
 0x14b   : > { %s928_s14 = smov 64   ;;  %s384_s10 = sand.u32 1, %s992_s24  }
 0x14c   : > { %375 = vrot.lane.b32.xlu0 %v611_v11, %s928_s14  ;;  %s286_s16 = scalar_lea.vmem [#allocation8], %s1111_s15  ;;  %s1167_s8 = scalar_lea.hbm %s1264_s4, %s1127_s17 }
 0x14d   : > { %s418_s26 = sshll.u32 %s286_s16, 4  ;;  %s293_s9 = scalar_lea.vmem [#allocation10], %s1111_s15  ;;  %s1169_s26 = int_to_ptr.vmem [resolvable:$true] %s418_s26 }
 0x14e   : > { %s1174_s30 = sshll.u32 %s293_s9, 4  ;;  %s1177_s24 = scalar_lea.sflag [#allocation9], %s384_s10  ;;  %s1208_s30 = int_to_ptr.vmem [resolvable:$true] %s1174_s30 }
 0x14f   : > { %s800_s6 = scalar_lea.vmem %s1169_s26, 64  ;;  %s929_s12 = smov [#allocation8]  }
 0x150   : > { %p801_p11 = scmp.ne.s32.totalorder %s1169_s26, %s800_s6  ;;  %s804_s21 = sshll.u32 %s929_s12, 4  ;;  %s805_s21 = int_to_ptr.vmem [resolvable:$false] %s804_s21 }
 0x151   : > { %s806_s29 = scalar_lea.vmem %s805_s21, 128  ;;  %p807_p9 = scmp.lt.s32.totalorder %s1169_s26, %s805_s21 }
 0x152   : > { %p802_p0 = pnand %p801_p11, %p1055_p10  ;;  %p808_p1 = scmp.lt.s32.totalorder %s806_s29, %s800_s6 }
 0x154   : > { %p803_p5 = pneg %p802_p0  ;;  %p809_p2 = por %p808_p1, %p807_p9 }
 0x156   : > { %p810_p7 = pnand %p809_p2, %p803_p5 }
 0x1ad   : > { %v372_v13 = vpop.permute.xlu0 %371 }
 0x1ae   : > { %374 = vst.msk [vmem:[%s286_s16] sm:$0xf] %vm365_vm2, %v372_v13 }
 0x1af   : > { %813 = shalt.err (!%p810_p7)
}
 0x1b0   : > { %s814_s14 = scalar_lea.hbm %s1167_s8, 64  ;;  %s818_s25 = scalar_lea.hbm %s1264_s4, 128 }
 0x1b1   : > { %p815_p3 = scmp.ne.s32.totalorder %s1167_s8, %s814_s14  ;;  %p819_p6 = scmp.lt.u32.totalorder %s1167_s8, %s1264_s4 }
 0x1b2   : > { %p820_p8 = scmp.lt.u32.totalorder %s818_s25, %s814_s14  ;;  %p822_p11 = scmp.lt.u32.totalorder %s814_s14, %s1167_s8 }
 0x1b3   : > { %p816_p13 = pnand %p815_p3, %p1055_p10 }
 0x1b4   : > { %p821_p12 = por %p820_p8, %p819_p6 }
 0x1b5   : > { %p817_p4 = pneg %p816_p13 }
 0x1b6   : > { %p823_p0 = por %p822_p11, %p821_p12 }
 0x1b8   : > { %p824_p5 = pnand %p823_p0, %p817_p4 }
 0x1ba   : > { %827 = shalt.err (!%p824_p5)
}
 0x1bb   : > { %630 = dma.vmem_to_hbm [thread:$0]  (%p1055_p10), %s1169_s26, 64, %s1167_s8, %s1177_s24  }
 0x1bc   : > { %s1205_s29 = scalar_lea.hbm %s1265_s5, %s1127_s17  ;;  %s828_s14 = scalar_lea.vmem %s1208_s30, 64 }
 0x1bd   : > { %p829_p9 = scmp.ne.s32.totalorder %s1208_s30, %s828_s14  ;;  %s930_s26 = smov [#allocation10]  }
 0x1be   : > { %v376_v14 = vpop.permute.xlu0 %375  ;;  %s832_s8 = sshll.u32 %s930_s26, 4  ;;  %s833_s8 = int_to_ptr.vmem [resolvable:$false] %s832_s8 }
 0x1bf   : > { %378 = vst.msk [vmem:[%s293_s9] sm:$0xf] %vm365_vm2, %v376_v14  ;;  %p830_p1 = pnand %p829_p9, %p1055_p10  ;;  %s834_s10 = scalar_lea.vmem %s833_s8, 128 }
 0x1c0   : > { %p835_p7 = scmp.lt.s32.totalorder %s1208_s30, %s833_s8  ;;  %p836_p3 = scmp.lt.s32.totalorder %s834_s10, %s828_s14 }
 0x1c1   : > { %p831_p2 = pneg %p830_p1 }
 0x1c2   : > { %p837_p13 = por %p836_p3, %p835_p7 }
 0x1c4   : > { %p838_p4 = pnand %p837_p13, %p831_p2 }
 0x1c6   : > { %841 = shalt.err (!%p838_p4)
}
 0x1c7   : > { %s842_s15 = scalar_lea.hbm %s1205_s29, 64  ;;  %s846_s16 = scalar_lea.hbm %s1265_s5, 128 }
 0x1c8   : > { %p843_p6 = scmp.ne.s32.totalorder %s1205_s29, %s842_s15  ;;  %p847_p11 = scmp.lt.u32.totalorder %s1205_s29, %s1265_s5 }
 0x1c9   : > { %p848_p0 = scmp.lt.u32.totalorder %s846_s16, %s842_s15  ;;  %p850_p9 = scmp.lt.u32.totalorder %s842_s15, %s1205_s29 }
 0x1ca   : > { %p844_p8 = pnand %p843_p6, %p1055_p10 }
 0x1cb   : > { %p849_p5 = por %p848_p0, %p847_p11 }
 0x1cc   : > { %p845_p12 = pneg %p844_p8 }
 0x1cd   : > { %p851_p1 = por %p850_p9, %p849_p5 }
 0x1cf   : > { %p852_p2 = pnand %p851_p1, %p845_p12 }
 0x1d1   : > { %855 = shalt.err (!%p852_p2)
}
 0x1d2   : > { %631 = dma.vmem_to_hbm [thread:$0]  (%p1055_p10), %s1208_s30, 64, %s1205_s29, %s1177_s24  }
 0x1d3 PF: > { %s444_s12 = sand.u32 1, %s898_s18   ;;  %p1282_p7 = scmp.ne.s32.totalorder %s1271_s27, 0 }
 0x1d4   : > { %p1283_p3 = scmp.ge.s32.totalorder %s918_s23, 2  ;;  %s445_s6 = scalar_lea.sflag [#allocation4], %s444_s12 }
 0x1d6   : > { %p644_p13 = pnand %p1283_p3, %p1282_p7 }
 0x1d8   : > { %889 = dma.done.wait (!%p644_p13), %s445_s6, 64  }
 0x1d9   : > { %891 = vsyncadd (!%p644_p13), %s445_s6, 4294967232  ;;  %s1284_s21 = sadd.s32 4294967294, %s918_s23  }
 0x1da   : > { %s453_s14 = sand.u32 1, %s1284_s21  }
 0x1db   : > { %s454_s26 = scalar_lea.sflag [#allocation9], %s453_s14 }
 0x1dc   : > { %893 = dma.done.wait (!%p644_p13), %s454_s26, 128  }
 0x1dd   : > { %895 = vsyncadd (!%p644_p13), %s454_s26, 4294967168  ;;  %s26_s23 = sadd.s32 1, %s918_s23   ;;  %s1285_s18 = smov %s902_s19 }
 0x1de   : > { %p23_p10 = scmp.ge.s32.totalorder %s26_s23, 4   ;;  %s1286_s19 = smov %s906_s20 }
 0x1df   : > { %s1287_s20 = smov %s1064_s13  ;;  %s1288_s21 = smov %s914_s22 }
 0x1e0   : > { %s1289_s22 = smov %s1291_s7  ;;  %25 = sbr.rel (!%p23_p10) target bundleno = 9 (0x9), region = 113 }
 0x1e7   :  { %468 = vsyncpa [#allocation3], 1 }
 0x1e8   :  { %470 = vsyncpa [#allocation3 + $0x1], 1 }
 0x1e9   :  { %471 = vsyncpa [#allocation6], 1 }
 0x1ea   :  { %472 = vsyncpa [#allocation4], 1 }
 0x1eb   :  { %474 = vsyncpa [#allocation4 + $0x1], 1 }
 0x1ec   :  { %475 = vsyncpa [#allocation9], 1 }
 0x1ed   :  { %477 = vsyncpa [#allocation9 + $0x1], 1 }

</bundles_post_ra>
